<compile_context>
chip_gen: v6e
topology: v6e:2x2x1
jax: 0.10.0
libtpu: 0.0.40
codegen_flags: <defaults>
</compile_context>

<pallas_src>
import jax
import jax.numpy as jnp
from jax.experimental import pallas as pl
from jax.experimental.pallas import tpu as pltpu

_LANE = 128                       # vreg lane width
_MAX_TILE_BYTES = 4 * 1024 * 1024  # ~4 MiB per buffer: near-roofline on v5e/v6e, ~88% on v7x
_VMEM_LIMIT = 40 * 1024 * 1024     # in+out double-buffered 4 MiB tiles ≈ 16 MiB + headroom


def _drop_path_kernel(scale_ref, x_ref, o_ref):
    # scale_ref: (TB, 1, 128) per-sample multiplier (0 or 1/keep_prob), already in x.dtype.
    # x_ref/o_ref: (TB, TM, 128) lane-dense tile.  One VPU multiply per element.
    o_ref[...] = x_ref[...] * scale_ref[...]


def drop_path(x, drop_prob, key, training=True, donate_x=False):
    """Pallas DropPath.  x: (B, ...) array.  Returns an array of the same shape/dtype."""
    if drop_prob == 0.0 or not training:
        return x                                   # identity fast-path (matches PyTorch)
    if x.size == 0:
        return x

    keep_prob = 1.0 - float(drop_prob)
    B = x.shape[0]
    orig_shape = x.shape
    dtype = x.dtype
    itemsize = jnp.dtype(dtype).itemsize
    sub = max(8, 32 // itemsize)                   # sublane alignment: 8 f32 / 16 bf16 / 32 int8

    # Per-sample Bernoulli(keep_prob) mask, pre-folded with the 1/keep_prob rescale and cast to
    # x.dtype so the in-kernel multiply stays in the input dtype.
    u = jax.random.uniform(key, (B,), jnp.float32)
    scale = (jnp.floor(keep_prob + u) / keep_prob).astype(dtype)       # (B,) in {0, 1/keep_prob}
    scale3 = jnp.broadcast_to(scale[:, None, None], (B, 1, _LANE))     # tiny lane-dense input

    flat = x.reshape(B, -1)
    n = flat.shape[1]
    rows = pl.cdiv(n, _LANE)                       # 128-lane rows per sample
    n_pad = rows * _LANE
    if n_pad != n:                                 # pad only to the next lane multiple
        flat = jnp.pad(flat, ((0, 0), (0, n_pad - n)))
    x3 = flat.reshape(B, rows, _LANE)              # lane-dense (B, rows, 128)

    # Tile selection: ~_MAX_TILE_BYTES per buffer (dtype-aware row budget).
    sample_bytes = rows * _LANE * itemsize
    max_rows = max(sub, (_MAX_TILE_BYTES // (_LANE * itemsize)) // sub * sub)
    if rows > max_rows:
        tb, tm = 1, max_rows                       # big samples: tile rows, 1 sample per step
    else:
        tm = rows                                  # small samples: whole sample per step,
        tb = max(1, min(B, _MAX_TILE_BYTES // max(sample_bytes, 1)))   # batch samples together

    # Guarantee >= 2 parallel grid steps so v7x's two TensorCores both stream.
    if pl.cdiv(B, tb) * pl.cdiv(rows, tm) < 2:
        if B >= 2:
            tb = pl.cdiv(B, 2)
        elif rows > sub:
            tm = pl.cdiv(pl.cdiv(rows, 2), sub) * sub

    grid = (pl.cdiv(B, tb), pl.cdiv(rows, tm))     # partial last blocks are masked by Pallas

    out3 = pl.pallas_call(
        _drop_path_kernel,
        out_shape=jax.ShapeDtypeStruct((B, rows, _LANE), dtype),
        grid_spec=pltpu.PrefetchScalarGridSpec(
            num_scalar_prefetch=0,
            grid=grid,
            in_specs=[
                pl.BlockSpec((tb, 1, _LANE), lambda b, r: (b, 0, 0)),    # per-sample scale
                pl.BlockSpec((tb, tm, _LANE), lambda b, r: (b, r, 0)),   # x tile
            ],
            out_specs=pl.BlockSpec((tb, tm, _LANE), lambda b, r: (b, r, 0)),
        ),
        compiler_params=pltpu.CompilerParams(
            dimension_semantics=("parallel", "parallel"),
            vmem_limit_bytes=_VMEM_LIMIT),
        input_output_aliases=({1: 0} if donate_x else {}),
    )(scale3, x3)

    out = out3.reshape(B, n_pad)
    if n_pad != n:
        out = out[:, :n]
    return out.reshape(orig_shape)


def _reference(x, drop_prob, key, training=True):
    """Pure-JAX mirror of the PyTorch DropPath.forward (same mask draw as the kernel)."""
    if drop_prob == 0.0 or not training:
        return x
    keep_prob = 1.0 - float(drop_prob)
    B = x.shape[0]
    u = jax.random.uniform(key, (B,), jnp.float32)
    random_tensor = jnp.floor(keep_prob + u)                 # per-sample 0/1
    bshape = (B,) + (1,) * (x.ndim - 1)
    return (x / keep_prob) * random_tensor.reshape(bshape).astype(x.dtype)


if __name__ == "__main__":
    root = jax.random.PRNGKey(0)
    kx, kmask, kx2, kx3 = jax.random.split(root, 4)
    drop_prob = 0.4

    # Main case: small ViT-like input (B, C, H, W); per-sample n = 1024 (already lane-aligned,
    # so no pad / no slice — the whole op is a single kernel HBM read+write).
    x = jax.random.normal(kx, (2, 4, 16, 16), jnp.float32)
    out = jax.block_until_ready(drop_path(x, drop_prob, kmask, training=True))
    ref = _reference(x, drop_prob, kmask, training=True)
    assert out.shape == x.shape and out.dtype == x.dtype
    assert jnp.allclose(out, ref, rtol=1e-6, atol=1e-6), "f32 mismatch vs reference"

    # Unaligned feature size (n = 35 -> padded to one 128-lane row; partial blocks masked).
    x2 = jax.random.normal(kx2, (3, 5, 7), jnp.float32)
    out2 = jax.block_until_ready(drop_path(x2, drop_prob, kmask, training=True))
    ref2 = _reference(x2, drop_prob, kmask, training=True)
    assert jnp.allclose(out2, ref2, rtol=1e-6, atol=1e-6), "unaligned-n mismatch vs reference"

    # bf16 path (dtype-aware tiling; multiply stays in bf16 like the PyTorch op does; the
    # mul-by-reciprocal vs divide difference is <= ~1 ulp of bf16, hence the looser tolerance).
    x3 = jax.random.normal(kx3, (2, 8, 96), jnp.float32).astype(jnp.bfloat16)
    out3 = jax.block_until_ready(drop_path(x3, drop_prob, kmask, training=True))
    ref3 = _reference(x3, drop_prob, kmask, training=True)
    assert out3.dtype == jnp.bfloat16
    assert jnp.allclose(out3.astype(jnp.float32), ref3.astype(jnp.float32),
                        rtol=2e-2, atol=2e-2), "bf16 mismatch vs reference"

    # Identity paths (eval mode / drop_prob == 0) return x unchanged, as in PyTorch.
    assert drop_path(x, 0.0, kmask, training=True) is x
    assert drop_path(x, drop_prob, kmask, training=False) is x

    print("KERNEL_OK")
</pallas_src>

<mosaic_0001>
module attributes {stable_mosaic.version = 11 : i64} {
  func.func @_drop_path_kernel(%arg0: i32, %arg1: i32, %arg2: memref<1x1x128xf32, #tpu.memory_space<vmem>>, %arg3: memref<1x8x128xf32, #tpu.memory_space<vmem>>, %arg4: memref<1x8x128xf32, #tpu.memory_space<vmem>>) attributes {dimension_semantics = [#tpu.dimension_semantics<parallel>, #tpu.dimension_semantics<parallel>], iteration_bounds = array<i64: 2, 1>, scalar_prefetch = 0 : i64, scratch_operands = 0 : i64, tpu.core_type = #tpu.core_type<tc>, window_params = [{transform_indices = @transform_0, window_bounds = array<i64: 1, 1, 128>}, {transform_indices = @transform_1, window_bounds = array<i64: 1, 8, 128>}, {transform_indices = @transform_2, window_bounds = array<i64: 1, 8, 128>}]} {
    %c0 = arith.constant 0 : index
    %c0_0 = arith.constant 0 : index
    %c0_1 = arith.constant 0 : index
    %0 = vector.load %arg3[%c0, %c0_0, %c0_1] : memref<1x8x128xf32, #tpu.memory_space<vmem>>, vector<1x8x128xf32>
    %c0_2 = arith.constant 0 : index
    %c0_3 = arith.constant 0 : index
    %c0_4 = arith.constant 0 : index
    %1 = vector.load %arg2[%c0_2, %c0_3, %c0_4] : memref<1x1x128xf32, #tpu.memory_space<vmem>>, vector<1x1x128xf32>
    %2 = vector.broadcast %1 : vector<1x1x128xf32> to vector<1x8x128xf32>
    %3 = arith.mulf %0, %2 : vector<1x8x128xf32>
    %c0_5 = arith.constant 0 : index
    %c0_6 = arith.constant 0 : index
    %c0_7 = arith.constant 0 : index
    %4 = vector.load %arg4[%c0_5, %c0_6, %c0_7] : memref<1x8x128xf32, #tpu.memory_space<vmem>>, vector<1x8x128xf32>
    tpu.vector_store %arg4[%c0_5, %c0_6, %c0_7], %3 {strides = array<i32>} : memref<1x8x128xf32, #tpu.memory_space<vmem>>, vector<1x8x128xf32>,
    return
  }
  func.func @transform_0(%arg0: i32, %arg1: i32) -> (i32, i32, i32) {
    %c0_i32 = arith.constant 0 : i32
    %c0_i32_0 = arith.constant 0 : i32
    %c0_i32_1 = arith.constant 0 : i32
    return %arg0, %c0_i32, %c0_i32_0 : i32, i32, i32
  }
  func.func @transform_1(%arg0: i32, %arg1: i32) -> (i32, i32, i32) {
    %c0_i32 = arith.constant 0 : i32
    %c0_i32_0 = arith.constant 0 : i32
    return %arg0, %arg1, %c0_i32 : i32, i32, i32
  }
  func.func @transform_2(%arg0: i32, %arg1: i32) -> (i32, i32, i32) {
    %c0_i32 = arith.constant 0 : i32
    %c0_i32_0 = arith.constant 0 : i32
    return %arg0, %arg1, %c0_i32 : i32, i32, i32
  }
}

</mosaic_0001>

<bundles_post_ra>
// kernel: tpu_custom_call.1
= control target key start
LH: loop header
LB: loop body
LE: loop exit
PB: predicated region body
PF: predicated region fallthrough
CT: control target
= control target key end

     0   :  { %7 = vsyncpa [#allocation3], 0  ;;  %s741_s0 = inlined_call_operand.hbm [shape: f32[2,1,128], index: 0, kind: input, shape index: {}]   ;;  %s742_s1 = inlined_call_operand.hbm [shape: f32[2,8,128], index: 1, kind: input, shape index: {}]   ;;  %s743_s2 = inlined_call_operand.hbm [shape: f32[2,8,128], index: 2, kind: output, shape index: {}]  }
   0x1   :  { %9 = vsyncpa [#allocation3 + $0x1], 0 }
   0x2   :  { %10 = vsyncpa [#allocation6], 0 }
   0x3   :  { %12 = vsyncpa [#allocation6 + $0x1], 0 }
   0x4   :  { %13 = vsyncpa [#allocation4], 0 }
   0x5   :  { %15 = vsyncpa [#allocation4 + $0x1], 0  ;;  %s577_s9 = smov 0   ;;  %s579_s10 = smov 0  }
   0x6   :  { %s581_s11 = smov 0   ;;  %s583_s12 = smov 0  }
   0x7   :  { %s585_s13 = smov 0   ;;  %s587_s14 = smov 0  }
   0x8 LB: > { %s335_s15 = sadd.s32 4294967295, %s557_s14   ;;  %s336_s16 = sadd.s32 4294967294, %s557_s14   ;;  %s557_s14 = sphi %s587_s14, %s21_s14   ;;  %s553_s13 = sphi %s585_s13, %s755_s13   ;;  %s549_s12 = sphi %s583_s12, %s754_s12   ;;  %s545_s11 = sphi %s581_s11, %s753_s11   ;;  %s541_s10 = sphi %s579_s10, %s752_s10   ;;  %s537_s9 = sphi %s577_s9, %s751_s9  }
   0x9   : > { %s33_s17 = sadd.s32 1, %s553_s13  ;;  %s40_s18 = sadd.s32 1, %s545_s11 }
   0xa   : > { %p35_p0 = scmp.ge.s32.totalorder %s33_s17, 2  ;;  %p47_p1 = scmp.ne.s32.totalorder %s545_s11, %s541_s10 }
   0xb   : > { %p48_p2 = scmp.eq.s32.totalorder %s557_s14, 0  ;;  %p53_p3 = scmp.ne.s32.totalorder %s541_s10, %s537_s9 }
   0xc   : > { %s757_s17 = smov (%p35_p0, %s33_s17), 0  ;;  %p54_p5 = scmp.eq.s32.totalorder %s335_s15, 0 }
   0xd   : > { %p618_p4 = por %p48_p2, %p47_p1  ;;  %s37_s20 = ssub.s32 %s553_s13, %s757_s17 }
   0xe   : > { %p107_p6 = scmp.eq.s32.totalorder %s335_s15, 1  ;;  %p38_p7 = scmp.eq.s32.totalorder %s37_s20, 0 }
   0xf   : > { %p624_p8 = por %p54_p5, %p53_p3  ;;  %p113_p10 = scmp.eq.s32.totalorder %s336_s16, 1 }
  0x10   : > { %p628_p9 = por %p107_p6, %p47_p1  ;;  %p367_p13 = scmp.lt.s32.totalorder %s557_s14, 2 }
  0x11   : > { %s633_s23 = scalar_select %p38_p7, %s545_s11, %s40_s18  }
  0x12   : > { %p635_p11 = por %p113_p10, %p53_p3  ;;  %s642_s25 = sand.u32 1, %s545_s11  }
  0x13   : > { %s339_s26 = sshll.u32 %s553_s13, 4  ;;  %s136_s27 = scalar_lea.vmem [#allocation2], %s642_s25 }
  0x14   : > { %s143_s28 = sshll.u32 %s136_s27, 4  ;;  %s141_s3 = scalar_lea.hbm %s741_s0, %s339_s26  ;;  %s144_s28 = int_to_ptr.vmem [resolvable:$true] %s143_s28 }
  0x15   : > { %p651_p0 = pnand %p367_p13, %p618_p4  ;;  %p342_p1 = scmp.ge.s32.totalorder %s557_s14, 1 }
  0x16   : > { %p167_p2 = scmp.lt.s32.totalorder %s557_s14, 3  ;;  %s340_s5 = sshll.u32 %s642_s25, 3 }
  0x17   : > { %s134_s6 = scalar_lea.sflag [#allocation3], %s642_s25  ;;  %p419_p3 = pneg %p651_p0 }
  0x18   : > { %s430_s7 = scalar_lea.vmem %s144_s28, 16  ;;  %s559_s8 = smov [#allocation2]  }
  0x19   : > { %p431_p5 = scmp.ne.s32.totalorder %s144_s28, %s430_s7  ;;  %s435_s15 = sshll.u32 %s559_s8, 4  ;;  %s436_s15 = int_to_ptr.vmem [resolvable:$false] %s435_s15 }
  0x1a   : > { %s437_s16 = scalar_lea.vmem %s436_s15, 32  ;;  %p438_p4 = scmp.lt.s32.totalorder %s144_s28, %s436_s15 }
  0x1b   : > { %p433_p6 = pnand %p431_p5, %p419_p3  ;;  %p439_p10 = scmp.lt.s32.totalorder %s437_s16, %s430_s7 }
  0x1d   : > { %p434_p7 = pneg %p433_p6  ;;  %p440_p13 = por %p439_p10, %p438_p4 }
  0x1f   : > { %p441_p12 = pnand %p440_p13, %p434_p7 }
  0x21   : > { %444 = shalt.err (!%p441_p12)
}
  0x22   : > { %359 = dma.hbm_to_vmem [thread:$0]  (!%p651_p0), %s141_s3, 16, %s144_s28, %s134_s6  }
  0x23   : > { %p670_p5 = pnand %p342_p1, %p167_p2  ;;  %s341_s19 = sshll.u32 %s553_s13, 7 }
  0x24   : > { %s154_s20 = scalar_lea.vmem [#allocation5], %s340_s5  ;;  %s160_s30 = scalar_lea.hbm %s742_s1, %s341_s19 }
  0x25   : > { %s162_s26 = sshll.u32 %s154_s20, 4  ;;  %s151_s7 = scalar_lea.sflag [#allocation6], %s642_s25  ;;  %s163_s26 = int_to_ptr.vmem [resolvable:$true] %s162_s26 }
  0x26   : > { %s458_s8 = scalar_lea.vmem %s163_s26, 128  ;;  %s560_s28 = smov [#allocation5]  }
  0x27   : > { %p459_p12 = scmp.ne.s32.totalorder %s163_s26, %s458_s8  ;;  %s463_s3 = sshll.u32 %s560_s28, 4  ;;  %s464_s3 = int_to_ptr.vmem [resolvable:$false] %s463_s3 }
  0x28   : > { %s465_s6 = scalar_lea.vmem %s464_s3, 256  ;;  %p466_p1 = scmp.lt.s32.totalorder %s163_s26, %s464_s3 }
  0x29   : > { %p461_p6 = pnand %p459_p12, %p419_p3  ;;  %p467_p2 = scmp.lt.s32.totalorder %s465_s6, %s458_s8 }
  0x2b   : > { %p462_p7 = pneg %p461_p6  ;;  %p468_p4 = por %p467_p2, %p466_p1 }
  0x2d   : > { %p469_p10 = pnand %p468_p4, %p462_p7 }
  0x2f   : > { %472 = shalt.err (!%p469_p10)
}
  0x30   : > { %362 = dma.hbm_to_vmem [thread:$0]  (!%p651_p0), %s160_s30, 128, %s163_s26, %s151_s7  }
  0x31   : > { %171 = sbr.rel (%p670_p5) target bundleno = 82 (0x52), region = 28  ;;  %s687_s25 = sand.u32 (!%p670_p5), 1, %s541_s10  }
  0x32   : > { %s174_s5 = scalar_lea.sflag (!%p670_p5), [#allocation3], %s687_s25  ;;  %s176_s15 = scalar_lea.vmem (!%p670_p5), [#allocation2], %s687_s25 }
  0x36   : > { %524 = dma.done.wait (%p624_p8), %s174_s5, 16  }
  0x37   : > { %526 = vsyncadd (%p624_p8), %s174_s5, 4294967280  ;;  %s343_s4 = sshll.u32 %s687_s25, 3  ;;  %s182_s16 = scalar_lea.sflag [#allocation6], %s687_s25 }
  0x38   : > { %s185_s18 = scalar_lea.vmem [#allocation5], %s343_s4 }
  0x39   : > { %528 = dma.done.wait (%p624_p8), %s182_s16, 128  }
  0x3a   : > { %530 = vsyncadd (%p624_p8), %s182_s16, 4294967168  ;;  %s209_s19 = scalar_lea.vmem [#allocation7], %s343_s4  ;;  %s347_s26 = sshll.u32 %s549_s12, 7  ;;  %v210_v0 = vld [vmem:[%s185_s18] sm:$0xff]  ;;  %v345_v1 = vld [vmem:[%s176_s15] ss:$0 sm:$0xff] }
  0x3b   : > { %s235_s20 = sshll.u32 %s209_s19, 4  ;;  %v218_v2 = vmul.f32 %v345_v1, %v210_v0  ;;  %s233_s30 = scalar_lea.hbm %s743_s2, %s347_s26  ;;  %s236_s20 = int_to_ptr.vmem [resolvable:$true] %s235_s20 }
  0x3c   : > { %s221_s7 = scalar_lea.sflag [#allocation4], %s687_s25  ;;  %s473_s8 = scalar_lea.vmem %s236_s20, 128 }
  0x3d   : > { %219 = vst [vmem:[%s209_s19] sm:$0xff] %v218_v2  ;;  %p474_p0 = scmp.ne.s32.totalorder %s236_s20, %s473_s8  ;;  %s561_s21 = smov [#allocation7]  }
  0x3e   : > { %s477_s28 = sshll.u32 %s561_s21, 4  ;;  %s478_s28 = int_to_ptr.vmem [resolvable:$false] %s477_s28 }
  0x3f   : > { %p475_p8 = pnand %p474_p0, %p628_p9  ;;  %s479_s3 = scalar_lea.vmem %s478_s28, 256 }
  0x40   : > { %p480_p13 = scmp.lt.s32.totalorder %s236_s20, %s478_s28  ;;  %p481_p5 = scmp.lt.s32.totalorder %s479_s3, %s473_s8 }
  0x41   : > { %p476_p3 = pneg %p475_p8 }
  0x42   : > { %p482_p12 = por %p481_p5, %p480_p13 }
  0x44   : > { %p483_p6 = pnand %p482_p12, %p476_p3 }
  0x46   : > { %486 = shalt.err (!%p483_p6)
}
  0x47   : > { %s487_s12 = scalar_lea.hbm %s233_s30, 128  ;;  %s491_s5 = scalar_lea.hbm %s743_s2, 256 }
  0x48   : > { %p488_p7 = scmp.ne.s32.totalorder %s233_s30, %s487_s12  ;;  %p492_p4 = scmp.lt.s32.totalorder %s233_s30, %s743_s2 }
  0x49   : > { %p493_p10 = scmp.lt.s32.totalorder %s491_s5, %s487_s12 }
  0x4a   : > { %p489_p1 = pnand %p488_p7, %p628_p9 }
  0x4b   : > { %p494_p0 = por %p493_p10, %p492_p4 }
  0x4c   : > { %p490_p2 = pneg %p489_p1 }
  0x4e   : > { %p495_p8 = pnand %p494_p0, %p490_p2 }
  0x50   : > { %498 = shalt.err (!%p495_p8)
}
  0x51   : > { %354 = dma.vmem_to_hbm [thread:$0]  (%p628_p9), %s236_s20, 128, %s233_s30, %s221_s7  }
  0x52 PF: > { %s247_s16 = sand.u32 1, %s537_s9   ;;  %p750_p3 = scmp.ge.s32.totalorder %s557_s14, 2 }
  0x53   : > { %s248_s18 = scalar_lea.sflag [#allocation4], %s247_s16 }
  0x54   : > { %p364_p13 = pnand %p750_p3, %p635_p11 }
  0x56   : > { %p365_p5 = pneg %p364_p13 }
  0x58   : > { %532 = dma.done.wait (%p365_p5), %s248_s18, 128  }
  0x59   : > { %534 = vsyncadd (%p365_p5), %s248_s18, 4294967168  ;;  %s21_s14 = sadd.s32 1, %s557_s14   ;;  %s751_s9 = smov %s541_s10 }
  0x5a   : > { %p18_p12 = scmp.ge.s32.totalorder %s21_s14, 4   ;;  %s752_s10 = smov %s545_s11 }
  0x5b   : > { %s753_s11 = smov %s633_s23  ;;  %s754_s12 = smov %s553_s13 }
  0x5c   : > { %s755_s13 = smov %s757_s17  ;;  %20 = sbr.rel (!%p18_p12) target bundleno = 8 (0x8), region = 86 }
  0x61   :  { %253 = vsyncpa [#allocation3], 1 }
  0x62   :  { %255 = vsyncpa [#allocation3 + $0x1], 1 }
  0x63   :  { %256 = vsyncpa [#allocation6], 1 }
  0x64   :  { %258 = vsyncpa [#allocation6 + $0x1], 1 }
  0x65   :  { %259 = vsyncpa [#allocation4], 1 }
  0x66   :  { %261 = vsyncpa [#allocation4 + $0x1], 1 }

</bundles_post_ra>
